<compile_context>
chip_gen: v6e
topology: v6e:2x2x1
jax: 0.10.0
libtpu: 0.0.40
codegen_flags: <defaults>
</compile_context>

<pallas_src>
import jax
import jax.numpy as jnp
from jax.experimental import pallas as pl
from jax.experimental.pallas import tpu as pltpu

KH = KW = 3  # 3x3 conv, padding = 1


def _conv_relu_kernel(x_ref, w_ref, b_ref, o_ref):
    """One batch-block per grid step.

    x_ref: (bn, H+2, Wp*Cin)     spatially padded rows, W & Cin folded on lanes
    w_ref: (KH*Wp*Cin, W*Cout)   block-Toeplitz conv weights (VMEM resident)
    b_ref: (1, W*Cout)           bias tiled per output column (VMEM resident)
    o_ref: (bn*H, W*Cout)        lane-dense output block
    """
    bn, hp, wc = x_ref.shape
    h = hp - (KH - 1)

    x = x_ref[...]
    # Row-only im2col: output row r needs padded input rows r, r+1, r+2.
    # 3 sublane-shifted slices + one lane concat (vs 9 per-tap relayouts).
    slabs = [x[:, kh:kh + h, :].reshape(bn * h, wc) for kh in range(KH)]
    lhs = jnp.concatenate(slabs, axis=-1)                 # (bn*H, KH*Wp*Cin)

    acc = jnp.dot(lhs, w_ref[...], preferred_element_type=jnp.float32)
    acc = acc + b_ref[...]                                # bias broadcast
    o_ref[...] = jnp.maximum(acc, 0.0).astype(o_ref.dtype)  # ReLU


def overlap_model_forward(x_nchw, weight, bias, *, batch_block=None):
    """Equivalent of OverlapModel(ConvReLU).forward(x).

    x_nchw : (N, Cin, H, W)   float32 (PyTorch NCHW convention)
    weight : (Cout, Cin, KH, KW)       (PyTorch Conv2d layout)
    bias   : (Cout,)
    returns: (N, Cout, H, W)
    """
    n, cin, h, w = x_nchw.shape
    cout = weight.shape[0]
    if batch_block is None:
        batch_block = n            # demo sizes: whole problem in one grid step
    assert n % batch_block == 0

    hp, wp = h + 2, w + 2
    wc = wp * cin                  # input row width on the lane axis
    kdim = KH * wc                 # matmul K (= 216 for the demo shape)
    ndim = w * cout                # matmul N / output lanes (= 128 here)

    # ---- layout glue (plain JAX, one fused XLA pass; tiny at these sizes) ---
    # TODO(synk): a real pipeline would keep NHWC / row-major activations
    # end-to-end and skip the NCHW<->NHWC transposes entirely.
    x_nhwc = jnp.transpose(x_nchw, (0, 2, 3, 1))                 # NCHW -> NHWC
    x_pad = jnp.pad(x_nhwc, ((0, 0), (1, 1), (1, 1), (0, 0)))    # pad = 1
    x_rows = x_pad.reshape(n, hp, wc)                            # (N, Hp, Wp*Cin)

    # Block-Toeplitz weights (built once, exactly, via masked broadcast — no
    # low-precision einsum):  rhs[kh*Wp*Cin + p*Cin + ci, w*Cout + co]
    #   = weight[co, ci, kh, kw]  where p == w + kw, else 0.
    w_hwio = jnp.transpose(weight, (2, 3, 1, 0))                 # (KH,KW,Cin,Cout)
    mask = (jnp.arange(wp)[None, :, None] ==
            (jnp.arange(w)[None, None, :] + jnp.arange(KW)[:, None, None]))
    mask = mask.astype(x_nchw.dtype)                             # (KW, Wp, W)
    rhs = (mask[None, :, :, None, :, None] *                     # (1,KW,Wp,1,W,1)
           w_hwio[:, :, None, :, None, :])                       # (KH,KW,1,Cin,1,Cout)
    rhs = rhs.sum(axis=1).reshape(kdim, ndim)                    # (KH*Wp*Cin, W*Cout)
    b_row = jnp.tile(bias, w).reshape(1, ndim)                   # (1, W*Cout)

    rows_per_block = batch_block * h
    # NOTE: at production channel/spatial sizes, shrink batch_block (or add a
    # row-tile grid axis) so the double-buffered block fits v7x's 64 MiB VMEM,
    # and raise vmem_limit_bytes if needed.  Not required at demo sizes.
    out2d = pl.pallas_call(
        _conv_relu_kernel,
        out_shape=jax.ShapeDtypeStruct((n * h, ndim), x_nchw.dtype),
        grid=(n // batch_block,),
        in_specs=[
            pl.BlockSpec((batch_block, hp, wc), lambda i: (i, 0, 0)),
            pl.BlockSpec((kdim, ndim), lambda i: (0, 0)),   # resident weights
            pl.BlockSpec((1, ndim), lambda i: (0, 0)),      # resident bias
        ],
        out_specs=pl.BlockSpec((rows_per_block, ndim), lambda i: (i, 0)),
        compiler_params=pltpu.CompilerParams(
            dimension_semantics=("parallel",)),              # v7x: 2 TCs
    )(x_rows, rhs, b_row)

    out_nhwc = out2d.reshape(n, h, w, cout)
    return jnp.transpose(out_nhwc, (0, 3, 1, 2))                 # NHWC -> NCHW


def _reference(x_nchw, weight, bias):
    """Pure-JAX reference (lax conv) for the correctness check."""
    y = jax.lax.conv_general_dilated(
        x_nchw, weight, window_strides=(1, 1), padding="SAME",
        dimension_numbers=("NCHW", "OIHW", "NCHW"))
    y = y + bias[None, :, None, None]
    return jnp.maximum(y, 0.0)


if __name__ == "__main__":
    key = jax.random.PRNGKey(0)
    k_x, k_w, k_b = jax.random.split(key, 3)

    N, CIN, H, W = 2, 4, 16, 16
    COUT = 8

    x = jax.random.normal(k_x, (N, CIN, H, W), dtype=jnp.float32)
    weight = jax.random.normal(k_w, (COUT, CIN, KH, KW), dtype=jnp.float32) * 0.1
    bias = jax.random.normal(k_b, (COUT,), dtype=jnp.float32) * 0.1

    out = jax.jit(overlap_model_forward)(x, weight, bias)
    out = jax.block_until_ready(out)

    ref = _reference(x, weight, bias)
    assert out.shape == (N, COUT, H, W)
    assert jnp.allclose(out, ref, atol=1e-4, rtol=1e-4)

    print("KERNEL_OK")
</pallas_src>

<mosaic_0001>
module attributes {stable_mosaic.version = 11 : i64} {
  func.func @_conv_relu_kernel(%arg0: i32, %arg1: memref<2x18x72xf32, #tpu.memory_space<vmem>>, %arg2: memref<216x128xf32, #tpu.memory_space<vmem>>, %arg3: memref<1x128xf32, #tpu.memory_space<vmem>>, %arg4: memref<32x128xf32, #tpu.memory_space<vmem>>) attributes {dimension_semantics = [#tpu.dimension_semantics<parallel>], iteration_bounds = array<i64: 1>, scalar_prefetch = 0 : i64, scratch_operands = 0 : i64, tpu.core_type = #tpu.core_type<tc>, window_params = [{transform_indices = @transform_0, window_bounds = array<i64: 2, 18, 72>}, {pipeline_mode = #tpu.pipeline_mode<synchronous>, transform_indices = @transform_1, window_bounds = array<i64: 216, 128>}, {pipeline_mode = #tpu.pipeline_mode<synchronous>, transform_indices = @transform_2, window_bounds = array<i64: 1, 128>}, {transform_indices = @transform_3, window_bounds = array<i64: 32, 128>}]} {
    %c0 = arith.constant 0 : index
    %c0_0 = arith.constant 0 : index
    %c0_1 = arith.constant 0 : index
    %0 = vector.load %arg1[%c0, %c0_0, %c0_1] : memref<2x18x72xf32, #tpu.memory_space<vmem>>, vector<2x18x72xf32>
    %1 = vector.extract_strided_slice %0 {offsets = [0, 0, 0], sizes = [2, 16, 72], strides = [1, 1, 1]} : vector<2x18x72xf32> to vector<2x16x72xf32>
    %2 = vector.shape_cast %1 : vector<2x16x72xf32> to vector<32x72xf32>
    %3 = vector.extract_strided_slice %0 {offsets = [0, 1, 0], sizes = [2, 16, 72], strides = [1, 1, 1]} : vector<2x18x72xf32> to vector<2x16x72xf32>
    %4 = vector.shape_cast %3 : vector<2x16x72xf32> to vector<32x72xf32>
    %5 = vector.extract_strided_slice %0 {offsets = [0, 2, 0], sizes = [2, 16, 72], strides = [1, 1, 1]} : vector<2x18x72xf32> to vector<2x16x72xf32>
    %6 = vector.shape_cast %5 : vector<2x16x72xf32> to vector<32x72xf32>
    %7 = tpu.concatenate %2, %4, %6 in 1 : vector<32x72xf32>, vector<32x72xf32>, vector<32x72xf32> -> vector<32x216xf32>
    %c0_2 = arith.constant 0 : index
    %c0_3 = arith.constant 0 : index
    %8 = vector.load %arg2[%c0_2, %c0_3] : memref<216x128xf32, #tpu.memory_space<vmem>>, vector<216x128xf32>
    %cst = arith.constant dense<0.000000e+00> : vector<32x128xf32>
    %9 = tpu.matmul %7, %8, %cst {dimension_numbers = #tpu.dot_dimension_numbers<[1], [0], [0], [1], [0, 0, 1, 1], [], []>} : vector<32x216xf32>, vector<216x128xf32>, vector<32x128xf32> -> vector<32x128xf32>
    %c0_4 = arith.constant 0 : index
    %c0_5 = arith.constant 0 : index
    %10 = vector.load %arg3[%c0_4, %c0_5] : memref<1x128xf32, #tpu.memory_space<vmem>>, vector<1x128xf32>
    %11 = vector.broadcast %10 : vector<1x128xf32> to vector<32x128xf32>
    %12 = arith.addf %9, %11 : vector<32x128xf32>
    %cst_6 = arith.constant 0.000000e+00 : f32
    %13 = vector.broadcast %cst_6 : f32 to vector<32x128xf32>
    %14 = arith.maximumf %12, %13 : vector<32x128xf32>
    %c0_7 = arith.constant 0 : index
    %c0_8 = arith.constant 0 : index
    %15 = vector.load %arg4[%c0_7, %c0_8] : memref<32x128xf32, #tpu.memory_space<vmem>>, vector<32x128xf32>
    tpu.vector_store %arg4[%c0_7, %c0_8], %14 {strides = array<i32>} : memref<32x128xf32, #tpu.memory_space<vmem>>, vector<32x128xf32>,
    return
  }
  func.func @transform_0(%arg0: i32) -> (i32, i32, i32) {
    %c0_i32 = arith.constant 0 : i32
    %c0_i32_0 = arith.constant 0 : i32
    %c0_i32_1 = arith.constant 0 : i32
    return %arg0, %c0_i32, %c0_i32_0 : i32, i32, i32
  }
  func.func @transform_1(%arg0: i32) -> (i32, i32) {
    %c0_i32 = arith.constant 0 : i32
    %c0_i32_0 = arith.constant 0 : i32
    %c0_i32_1 = arith.constant 0 : i32
    return %c0_i32, %c0_i32_0 : i32, i32
  }
  func.func @transform_2(%arg0: i32) -> (i32, i32) {
    %c0_i32 = arith.constant 0 : i32
    %c0_i32_0 = arith.constant 0 : i32
    %c0_i32_1 = arith.constant 0 : i32
    return %c0_i32, %c0_i32_0 : i32, i32
  }
  func.func @transform_3(%arg0: i32) -> (i32, i32) {
    %c0_i32 = arith.constant 0 : i32
    %c0_i32_0 = arith.constant 0 : i32
    return %arg0, %c0_i32 : i32, i32
  }
}

</mosaic_0001>

<bundles_post_ra>
// kernel: tile.8
= control target key start
LH: loop header
LB: loop body
LE: loop exit
PB: predicated region body
PF: predicated region fallthrough
CT: control target
= control target key end

     0   :  { %s28_s0 = inlined_call_operand.vmem [shape: f32[8], index: 0, kind: input, shape index: {}]   ;;  %s29_s1 = inlined_call_operand.vmem [shape: f32[16,8], index: 1, kind: output, shape index: {}]  }
   0x1   :  { %v4_v0 = vld [vmem:[%s28_s0] ss:$0 sm:$0xff] }
   0x2   :  { %5 = vst [vmem:[%s29_s1] sm:$0xff] %v4_v0  ;;  %8 = vst [vmem:[%s29_s1 + $0x8] sm:$0xff] %v4_v0 }

// kernel: tile.9
= control target key start
LH: loop header
LB: loop body
LE: loop exit
PB: predicated region body
PF: predicated region fallthrough
CT: control target
= control target key end

     0   :  { %s133_s10 = smov 120   ;;  %s134_s11 = smov 104   ;;  %vm3_vm0 = vcmask 64512   ;;  %vm9_vm1 = vcmask 1048512   ;;  %vm15_vm2 = vcmask 982912   ;;  %vm21_vm3 = vcmask 917312   ;;  %s209_s0 = inlined_call_operand.vmem [shape: f32[16,8], index: 0, kind: input, shape index: {}]   ;;  %s210_s1 = inlined_call_operand.vmem [shape: f32[1,128], index: 1, kind: output, shape index: {}]  }
   0x1   :  { %v103_v0 = vld [vmem:[%s209_s0 + $0xf] sm:$0x1]   ;;  %v105_v1 = vld [vmem:[%s209_s0 + $0xd] sm:$0x1]   ;;  %v104_v2 = vld [vmem:[%s209_s0 + $0xe] sm:$0x1]  }
   0x2   :  { %7 = vrot.lane.b32.xlu0 %v103_v0, %s133_s10  ;;  %19 = vrot.lane.b32.xlu1 %v105_v1, %s134_s11  ;;  %v106_v3 = vld [vmem:[%s209_s0 + $0xc] sm:$0x1]   ;;  %s135_s16 = smov 112   ;;  %s136_s17 = smov 96   ;;  %v107_v4 = vld [vmem:[%s209_s0 + $0xb] sm:$0x1]  }
   0x3   :  { %v108_v5 = vld [vmem:[%s209_s0 + $0xa] sm:$0x1]   ;;  %v2_v6 = vld [vmem:[%s209_s0] sm:$0x1]   ;;  %s137_s24 = smov 88   ;;  %s138_s25 = smov 80  }
   0x4   :  { %4 = vst.msk [vmem:[#allocation0] sm:$0x1] %vm3_vm0, %v2_v6   ;;  %v109_v7 = vld [vmem:[%s209_s0 + $0x9] sm:$0x1]   ;;  %v110_v8 = vld [vmem:[%s209_s0 + $0x8] sm:$0x1]  }
   0x5   :  { %s139_s30 = smov 72   ;;  %s140_s2 = smov 64   ;;  %v111_v9 = vld [vmem:[%s209_s0 + $0x7] sm:$0x1]   ;;  %v112_v10 = vld [vmem:[%s209_s0 + $0x6] sm:$0x1]  }
   0x6   :  { %13 = vrot.lane.b32.xlu0 %v104_v2, %s135_s16  ;;  %25 = vrot.lane.b32.xlu1 %v106_v3, %s136_s17  ;;  %s141_s7 = smov 56   ;;  %s142_s8 = smov 48   ;;  %v113_v11 = vld [vmem:[%s209_s0 + $0x5] sm:$0x1]   ;;  %v114_v12 = vld [vmem:[%s209_s0 + $0x4] sm:$0x1]  }
   0x7   :  { %s143_s13 = smov 40   ;;  %s144_s14 = smov 32   ;;  %v115_v13 = vld [vmem:[%s209_s0 + $0x3] sm:$0x1]   ;;  %v116_v14 = vld [vmem:[%s209_s0 + $0x2] sm:$0x1]  }
   0x8   :  { %s145_s19 = smov 24   ;;  %s146_s20 = smov 16   ;;  %v117_v15 = vld [vmem:[%s209_s0 + $0x1] sm:$0x1]   ;;  %vm27_vm4 = vcmask 851712   ;;  %vm33_vm5 = vcmask 786112  }
   0x9   :  { %s147_s0 = smov 8   ;;  %vm39_vm6 = vcmask 720512   ;;  %vm45_vm7 = vcmask 654912   ;;  %vm51_vm8 = vcmask 589312   ;;  %vm57_vm9 = vcmask 523712  }
   0xa   :  { %31 = vrot.lane.b32.xlu0 %v107_v4, %s137_s24  ;;  %37 = vrot.lane.b32.xlu1 %v108_v5, %s138_s25  ;;  %vm63_vm10 = vcmask 458112   ;;  %vm69_vm11 = vcmask 392512   ;;  %vm75_vm12 = vcmask 326912   ;;  %vm81_vm13 = vcmask 261312  }
   0xb   :  { %vm87_vm14 = vcmask 195712   ;;  %vm93_vm15 = vcmask 130112  }
   0xe   :  { %43 = vrot.lane.b32.xlu0 %v109_v7, %s139_s30  ;;  %49 = vrot.lane.b32.xlu1 %v110_v8, %s140_s2 }
  0x12   :  { %55 = vrot.lane.b32.xlu0 %v111_v9, %s141_s7  ;;  %61 = vrot.lane.b32.xlu1 %v112_v10, %s142_s8 }
  0x16   :  { %67 = vrot.lane.b32.xlu0 %v113_v11, %s143_s13  ;;  %73 = vrot.lane.b32.xlu1 %v114_v12, %s144_s14 }
  0x1a   :  { %79 = vrot.lane.b32.xlu0 %v115_v13, %s145_s19  ;;  %85 = vrot.lane.b32.xlu1 %v116_v14, %s146_s20 }
  0x1e   :  { %91 = vrot.lane.b32.xlu0 %v117_v15, %s147_s0 }
  0x74   :  { %v8_v16 = vpop.permute.xlu0 %7   ;;  %v20_v17 = vpop.permute.xlu1 %19  }
  0x75   :  { %10 = vst.msk [vmem:[#allocation0] sm:$0x1] %vm9_vm1, %v8_v16  }
  0x78   :  { %v14_v18 = vpop.permute.xlu0 %13   ;;  %v26_v19 = vpop.permute.xlu1 %25  }
  0x79   :  { %16 = vst.msk [vmem:[#allocation0] sm:$0x1] %vm15_vm2, %v14_v18  }
  0x7a   :  { %22 = vst.msk [vmem:[#allocation0] sm:$0x1] %vm21_vm3, %v20_v17  }
  0x7b   :  { %28 = vst.msk [vmem:[#allocation0] sm:$0x1] %vm27_vm4, %v26_v19  }
  0x7c   :  { %v32_v20 = vpop.permute.xlu0 %31   ;;  %v38_v21 = vpop.permute.xlu1 %37  }
  0x7d   :  { %34 = vst.msk [vmem:[#allocation0] sm:$0x1] %vm33_vm5, %v32_v20  }
  0x7e   :  { %40 = vst.msk [vmem:[#allocation0] sm:$0x1] %vm39_vm6, %v38_v21  }
  0x80   :  { %v44_v22 = vpop.permute.xlu0 %43   ;;  %v50_v23 = vpop.permute.xlu1 %49  }
  0x81   :  { %46 = vst.msk [vmem:[#allocation0] sm:$0x1] %vm45_vm7, %v44_v22  }
  0x82   :  { %52 = vst.msk [vmem:[#allocation0] sm:$0x1] %vm51_vm8, %v50_v23  }
  0x84   :  { %v56_v24 = vpop.permute.xlu0 %55   ;;  %v62_v25 = vpop.permute.xlu1 %61  }
  0x85   :  { %58 = vst.msk [vmem:[#allocation0] sm:$0x1] %vm57_vm9, %v56_v24  }
  0x86   :  { %64 = vst.msk [vmem:[#allocation0] sm:$0x1] %vm63_vm10, %v62_v25  }
  0x88   :  { %v68_v26 = vpop.permute.xlu0 %67   ;;  %v74_v27 = vpop.permute.xlu1 %73  }
  0x89   :  { %70 = vst.msk [vmem:[#allocation0] sm:$0x1] %vm69_vm11, %v68_v26  }
  0x8a   :  { %76 = vst.msk [vmem:[#allocation0] sm:$0x1] %vm75_vm12, %v74_v27  }
  0x8c   :  { %v80_v28 = vpop.permute.xlu0 %79   ;;  %v86_v29 = vpop.permute.xlu1 %85  }
  0x8d   :  { %82 = vst.msk [vmem:[#allocation0] sm:$0x1] %vm81_vm13, %v80_v28  }
  0x8e   :  { %88 = vst.msk [vmem:[#allocation0] sm:$0x1] %vm87_vm14, %v86_v29  }
  0x90   :  { %v92_v30 = vpop.permute.xlu0 %91  }
  0x91   :  { %94 = vst.msk [vmem:[#allocation0] sm:$0x1] %vm93_vm15, %v92_v30  }
  0x98   :  { %v99_v31 = vld [vmem:[#allocation0] sm:$0x1] }
  0x99   :  { %102 = vst [vmem:[%s210_s1] sm:$0x1] %v99_v31 }

// kernel: overlap_model_forward.1
= control target key start
LH: loop header
LB: loop body
LE: loop exit
PB: predicated region body
PF: predicated region fallthrough
CT: control target
= control target key end

     0   :  { %vm37_vm0 = vcmask 1045504   ;;  %vm26_vm1 = vcmask 1046528   ;;  %v288_v3 = vmov 0.0   ;;  %s289_s28 = smov 16   ;;  %s290_s29 = smov 72   ;;  %vm77_vm2 = vcmask 130048   ;;  %s523_s0 = inlined_call_operand.vmem [shape: f32[2,18,72], index: 0, kind: input, shape index: {}]   ;;  %s524_s1 = inlined_call_operand.vmem [shape: f32[216,128], index: 1, kind: input, shape index: {}]   ;;  %s525_s2 = inlined_call_operand.vmem [shape: f32[1,128], index: 2, kind: input, shape index: {}]   ;;  %s526_s3 = inlined_call_operand.vmem [shape: f32[32,128], index: 3, kind: output, shape index: {}]  }
   0x1   :  { %v314_v0 = vld [vmem:[%s523_s0] sm:$0xff]  ;;  %v319_v1 = vld [vmem:[%s523_s0 + $0x8] sm:$0xff]  ;;  %v324_v2 = vld [vmem:[%s523_s0 + $0x18] sm:$0xff]  ;;  %129 = vmatprep.subr.mxu0 %v288_v3  ;;  %231 = vmatprep.subr.mxu1 %v288_v3  ;;  %vm72_vm3 = vcmask 588800   ;;  %vm116_vm4 = vcmask 719872  }
   0x2   :  { %v38_v4 = vrot.slane %v314_v0, 2  ;;  %v39_v5 = vrot.slane %v319_v1, 2  ;;  %v27_v6 = vrot.slane %v314_v0, 1  ;;  %v28_v7 = vrot.slane %v319_v1, 1  ;;  %v335_v8 = vld [vmem:[%s523_s0 + $0x20] sm:$0xff]  ;;  %v97_v9 = vld [vmem:[%s524_s1 + $0x78] sm:$0xff] }
   0x3   :  { %v43_v10 = vrot.slane %v324_v2, 2  ;;  %v44_v11 = vrot.slane %v335_v8, 2  ;;  %v32_v12 = vrot.slane %v324_v2, 1  ;;  %v33_v13 = vrot.slane %v335_v8, 1  ;;  %v19_v14 = vld [vmem:[%s523_s0 + $0x28] sm:$0x3]  ;;  %130 = vmatpush1.msra.mxu0 %v97_v9  ;;  %258 = vmatpush1.msra.mxu1 %v97_v9 }
   0x4   :  { %v40_v15 = vsel %vm37_vm0, %v38_v4, %v39_v5  ;;  %v29_v16 = vsel %vm26_vm1, %v27_v6, %v28_v7  ;;  %v16_v17 = vld [vmem:[%s523_s0 + $0x10] sm:$0x3]  ;;  %131 = vmatprep.subr.mxu0 %v288_v3  ;;  %232 = vmatprep.subr.mxu1 %v288_v3  ;;  %v95_v19 = vld [vmem:[%s524_s1 + $0x68] sm:$0xff]  ;;  %v35_v22 = vrot.slane %v19_v14, 1  ;;  %v94_v24 = vld [vmem:[%s524_s1 + $0x60] sm:$0xff]  ;;  %v46_v27 = vrot.slane %v19_v14, 2 }
   0x5   :  { %v96_v18 = vld [vmem:[%s524_s1 + $0x70] sm:$0xff]  ;;  %60 = vrot.lane.b32.xlu1 %v40_v15, %s289_s28  ;;  %48 = vrot.lane.b32.xlu0 %v29_v16, %s290_s29  ;;  %v45_v20 = vsel %vm37_vm0, %v43_v10, %v44_v11  ;;  %v34_v21 = vsel %vm26_vm1, %v32_v12, %v33_v13  ;;  %v30_v23 = vrot.slane %v16_v17, 1  ;;  %v41_v28 = vrot.slane %v16_v17, 2  ;;  %v93_v29 = vld [vmem:[%s524_s1 + $0x58] sm:$0xff] }
   0x6   :  { %132 = vmatpush1.msra.mxu0 %v96_v18  ;;  %259 = vmatpush1.msra.mxu1 %v96_v18  ;;  %v36_v25 = vsel %vm26_vm1, %v33_v13, %v35_v22  ;;  %v92_v30 = vld [vmem:[%s524_s1 + $0x50] sm:$0xff]  ;;  %v47_v31 = vsel %vm37_vm0, %v44_v11, %v46_v27  ;;  %v91_v33 = vld [vmem:[%s524_s1 + $0x48] sm:$0xff]  ;;  %v90_v34 = vld [vmem:[%s524_s1 + $0x40] sm:$0xff] }
   0x7   :  { %133 = vmatprep.subr.mxu0 %v288_v3  ;;  %233 = vmatprep.subr.mxu1 %v288_v3  ;;  %v31_v26 = vsel %vm26_vm1, %v28_v7, %v30_v23  ;;  %v42_v32 = vsel %vm37_vm0, %v39_v5, %v41_v28  ;;  %v89_v35 = vld [vmem:[%s524_s1 + $0x38] sm:$0xff]  ;;  %v88_v36 = vld [vmem:[%s524_s1 + $0x30] sm:$0xff]  ;;  %v87_v37 = vld [vmem:[%s524_s1 + $0x28] sm:$0xff] }
   0x8   :  { %134 = vmatpush1.msra.mxu0 %v95_v19  ;;  %260 = vmatpush1.msra.mxu1 %v95_v19  ;;  %v86_v38 = vld [vmem:[%s524_s1 + $0x20] sm:$0xff]  ;;  %v85_v39 = vld [vmem:[%s524_s1 + $0x18] sm:$0xff]  ;;  %v84_v40 = vld [vmem:[%s524_s1 + $0x10] sm:$0xff] }
   0x9   :  { %64 = vrot.lane.b32.xlu1 %v45_v20, %s289_s28  ;;  %52 = vrot.lane.b32.xlu0 %v34_v21, %s290_s29  ;;  %v83_v41 = vld [vmem:[%s524_s1 + $0x8] sm:$0xff]  ;;  %v82_v42 = vld [vmem:[%s524_s1] sm:$0xff] }
   0xa   :  { %135 = vmatprep.subr.mxu0 %v288_v3  ;;  %234 = vmatprep.subr.mxu1 %v288_v3  ;;  %v108_v43 = vld [vmem:[%s524_s1 + $0xd0] sm:$0xff]  ;;  %v107_v44 = vld [vmem:[%s524_s1 + $0xc8] sm:$0xff]  ;;  %v106_v45 = vld [vmem:[%s524_s1 + $0xc0] sm:$0xff] }
   0xb   :  { %136 = vmatpush1.msra.mxu0 %v94_v24  ;;  %261 = vmatpush1.msra.mxu1 %v94_v24  ;;  %v105_v46 = vld [vmem:[%s524_s1 + $0xb8] sm:$0xff]  ;;  %v104_v47 = vld [vmem:[%s524_s1 + $0xb0] sm:$0xff]  ;;  %v103_v48 = vld [vmem:[%s524_s1 + $0xa8] sm:$0xff] }
   0xc   :  { %137 = vmatprep.subr.mxu0 %v288_v3  ;;  %235 = vmatprep.subr.mxu1 %v288_v3  ;;  %v102_v49 = vld [vmem:[%s524_s1 + $0xa0] sm:$0xff]  ;;  %v101_v50 = vld [vmem:[%s524_s1 + $0x98] sm:$0xff]  ;;  %v100_v51 = vld [vmem:[%s524_s1 + $0x90] sm:$0xff] }
   0xd   :  { %54 = vrot.lane.b32.xlu1 %v36_v25, %s290_s29  ;;  %50 = vrot.lane.b32.xlu0 %v31_v26, %s290_s29  ;;  %v99_v52 = vld [vmem:[%s524_s1 + $0x88] sm:$0xff]  ;;  %v98_v53 = vld [vmem:[%s524_s1 + $0x80] sm:$0xff] }
   0xe   :  { %138 = vmatpush1.msra.mxu0 %v93_v29  ;;  %262 = vmatpush1.msra.mxu1 %v93_v29  ;;  %v226_v7 = vld [vmem:[%s525_s2] ss:$0 sm:$0xff] }
   0xf   :  { %139 = vmatprep.subr.mxu0 %v288_v3  ;;  %236 = vmatprep.subr.mxu1 %v288_v3 }
  0x10   :  { %140 = vmatpush1.msra.mxu0 %v92_v30  ;;  %263 = vmatpush1.msra.mxu1 %v92_v30 }
  0x11   :  { %66 = vrot.lane.b32.xlu1 %v47_v31, %s289_s28  ;;  %62 = vrot.lane.b32.xlu0 %v42_v32, %s289_s28 }
  0x12   :  { %141 = vmatprep.subr.mxu0 %v288_v3  ;;  %237 = vmatprep.subr.mxu1 %v288_v3 }
  0x13   :  { %142 = vmatpush1.msra.mxu0 %v91_v33  ;;  %264 = vmatpush1.msra.mxu1 %v91_v33 }
  0x14   :  { %143 = vmatprep.subr.mxu0 %v288_v3  ;;  %238 = vmatprep.subr.mxu1 %v288_v3 }
  0x15   :  { %144 = vmatpush1.msra.mxu0 %v90_v34  ;;  %265 = vmatpush1.msra.mxu1 %v90_v34 }
  0x16   :  { %145 = vmatprep.subr.mxu0 %v288_v3  ;;  %239 = vmatprep.subr.mxu1 %v288_v3 }
  0x17   :  { %146 = vmatpush1.msra.mxu0 %v89_v35  ;;  %266 = vmatpush1.msra.mxu1 %v89_v35 }
  0x18   :  { %147 = vmatprep.subr.mxu0 %v288_v3  ;;  %240 = vmatprep.subr.mxu1 %v288_v3 }
  0x19   :  { %148 = vmatpush1.msra.mxu0 %v88_v36  ;;  %267 = vmatpush1.msra.mxu1 %v88_v36 }
  0x1a   :  { %149 = vmatprep.subr.mxu0 %v288_v3  ;;  %241 = vmatprep.subr.mxu1 %v288_v3 }
  0x1b   :  { %150 = vmatpush1.msra.mxu0 %v87_v37  ;;  %268 = vmatpush1.msra.mxu1 %v87_v37 }
  0x1c   :  { %151 = vmatprep.subr.mxu0 %v288_v3  ;;  %242 = vmatprep.subr.mxu1 %v288_v3 }
  0x1d   :  { %152 = vmatpush1.msra.mxu0 %v86_v38  ;;  %269 = vmatpush1.msra.mxu1 %v86_v38 }
  0x1e   :  { %153 = vmatprep.subr.mxu0 %v288_v3  ;;  %243 = vmatprep.subr.mxu1 %v288_v3 }
  0x1f   :  { %154 = vmatpush1.msra.mxu0 %v85_v39  ;;  %270 = vmatpush1.msra.mxu1 %v85_v39 }
  0x20   :  { %155 = vmatprep.subr.mxu0 %v288_v3  ;;  %244 = vmatprep.subr.mxu1 %v288_v3 }
  0x21   :  { %156 = vmatpush1.msra.mxu0 %v84_v40  ;;  %271 = vmatpush1.msra.mxu1 %v84_v40 }
  0x22   :  { %157 = vmatprep.subr.mxu0 %v288_v3  ;;  %245 = vmatprep.subr.mxu1 %v288_v3 }
  0x23   :  { %158 = vmatpush1.msra.mxu0 %v83_v41  ;;  %272 = vmatpush1.msra.mxu1 %v83_v41 }
  0x24   :  { %159 = vmatprep.subr.mxu0 %v288_v3  ;;  %246 = vmatprep.subr.mxu1 %v288_v3 }
  0x25   :  { %160 = vmatpush1.msra.mxu0 %v82_v42  ;;  %273 = vmatpush1.msra.mxu1 %v82_v42 }
  0x26   :  { %171 = vmatprep.subr.mxu0 %v288_v3  ;;  %247 = vmatprep.subr.mxu1 %v288_v3 }
  0x27   :  { %172 = vmatpush2.msra.mxu0 %v108_v43  ;;  %274 = vmatpush2.msra.mxu1 %v108_v43 }
  0x28   :  { %173 = vmatprep.subr.mxu0 %v288_v3  ;;  %248 = vmatprep.subr.mxu1 %v288_v3 }
  0x29   :  { %174 = vmatpush2.msra.mxu0 %v107_v44  ;;  %275 = vmatpush2.msra.mxu1 %v107_v44 }
  0x2a   :  { %175 = vmatprep.subr.mxu0 %v288_v3  ;;  %249 = vmatprep.subr.mxu1 %v288_v3 }
  0x2b   :  { %176 = vmatpush2.msra.mxu0 %v106_v45  ;;  %276 = vmatpush2.msra.mxu1 %v106_v45 }
  0x2c   :  { %177 = vmatprep.subr.mxu0 %v288_v3  ;;  %250 = vmatprep.subr.mxu1 %v288_v3 }
  0x2d   :  { %178 = vmatpush2.msra.mxu0 %v105_v46  ;;  %277 = vmatpush2.msra.mxu1 %v105_v46 }
  0x2e   :  { %179 = vmatprep.subr.mxu0 %v288_v3  ;;  %251 = vmatprep.subr.mxu1 %v288_v3 }
  0x2f   :  { %180 = vmatpush2.msra.mxu0 %v104_v47  ;;  %278 = vmatpush2.msra.mxu1 %v104_v47 }
  0x30   :  { %181 = vmatprep.subr.mxu0 %v288_v3  ;;  %252 = vmatprep.subr.mxu1 %v288_v3 }
  0x31   :  { %182 = vmatpush2.msra.mxu0 %v103_v48  ;;  %279 = vmatpush2.msra.mxu1 %v103_v48 }
  0x32   :  { %183 = vmatprep.subr.mxu0 %v288_v3  ;;  %253 = vmatprep.subr.mxu1 %v288_v3 }
  0x33   :  { %184 = vmatpush2.msra.mxu0 %v102_v49  ;;  %280 = vmatpush2.msra.mxu1 %v102_v49 }
  0x34   :  { %185 = vmatprep.subr.mxu0 %v288_v3  ;;  %254 = vmatprep.subr.mxu1 %v288_v3 }
  0x35   :  { %186 = vmatpush2.msra.mxu0 %v101_v50  ;;  %281 = vmatpush2.msra.mxu1 %v101_v50 }
  0x36   :  { %187 = vmatprep.subr.mxu0 %v288_v3  ;;  %255 = vmatprep.subr.mxu1 %v288_v3 }
  0x37   :  { %188 = vmatpush2.msra.mxu0 %v100_v51  ;;  %282 = vmatpush2.msra.mxu1 %v100_v51 }
  0x38   :  { %189 = vmatprep.subr.mxu0 %v288_v3  ;;  %256 = vmatprep.subr.mxu1 %v288_v3 }
  0x39   :  { %190 = vmatpush2.msra.mxu0 %v99_v52  ;;  %283 = vmatpush2.msra.mxu1 %v99_v52 }
  0x3a   :  { %191 = vmatprep.subr.mxu0 %v288_v3  ;;  %257 = vmatprep.subr.mxu1 %v288_v3 }
  0x3b   :  { %192 = vmatpush2.msra.mxu0 %v98_v53  ;;  %284 = vmatpush2.msra.mxu1 %v98_v53 }
  0x77   :  { %v61_v54 = vpop.permute.xlu1 %60  ;;  %v49_v55 = vpop.permute.xlu0 %48 }
  0x78   :  { %v78_v56 = vsel %vm77_vm2, %v49_v55, %v61_v54  ;;  %v73_v57 = vsel %vm72_vm3, %v314_v0, %v49_v55 }
  0x79   :  { %227 = vmatprep.mubr.msk.f32.mxu0 %vm116_vm4, %v78_v56 }
  0x7a   :  { %194 = vmatmul.mubr.f32.vlgmr.msra.gmra.mxu0 %v73_v57 }
  0x7b   :  { %v65_v58 = vpop.permute.xlu1 %64  ;;  %v53_v59 = vpop.permute.xlu0 %52 }
  0x7c   :  { %v80_v60 = vsel %vm77_vm2, %v53_v59, %v65_v58  ;;  %v75_v61 = vsel %vm72_vm3, %v324_v2, %v53_v59 }
  0x7d   :  { %229 = vmatprep.mubr.msk.f32.mxu1 %vm116_vm4, %v80_v60 }
  0x7e   :  { %204 = vmatmul.mubr.f32.vlgmr.msra.gmra.mxu1 %v75_v61 }
  0x7f   :  { %v55_v62 = vpop.permute.xlu1 %54  ;;  %v51_v63 = vpop.permute.xlu0 %50 }
  0x80   :  { %v74_v6 = vsel %vm72_vm3, %v319_v1, %v51_v63  ;;  %v76_v2 = vsel %vm72_vm3, %v335_v8, %v55_v62 }
  0x83   :  { %v67_v3 = vpop.permute.xlu1 %66  ;;  %v63_v4 = vpop.permute.xlu0 %62 }
  0x84   :  { %v81_v5 = vsel %vm77_vm2, %v55_v62, %v67_v3  ;;  %v79_v0 = vsel %vm77_vm2, %v51_v63, %v63_v4 }
  0x85   :  { %228 = vmatprep.mubr.msk.f32.mxu0 %vm116_vm4, %v79_v0  ;;  %230 = vmatprep.mubr.msk.f32.mxu1 %vm116_vm4, %v81_v5 }
  0x86   :  { %199 = vmatmul.mubr.f32.gmra.mxu0 %v74_v6  ;;  %209 = vmatmul.mubr.f32.gmra.mxu1 %v76_v2 }
 0x13a   :  { %v195_v9 = vpop.f32.mrf.mxu0 }
 0x13b   :  { %v196_v10 = vadd.f32 %v226_v7, %v195_v9 }
 0x13c   :  { %v197_v11 = vpop.f32.mrf.mxu0 }
 0x13d   :  { %v214_v12 = vmax.f32 %v196_v10, 0.0 }
 0x13e   :  { %v205_v13 = vpop.f32.mrf.mxu1 }
 0x13f   :  { %218 = vst [vmem:[%s526_s3] sm:$0xff] %v214_v12  ;;  %v206_v14 = vadd.f32 %v226_v7, %v205_v13 }
 0x140   :  { %v207_v1 = vpop.f32.mrf.mxu1 }
 0x141   :  { %v216_v15 = vmax.f32 %v206_v14, 0.0 }
 0x143   :  { %220 = vst [vmem:[%s526_s3 + $0x10] sm:$0xff] %v216_v15 }
 0x146   :  { %v200_v8 = vpop.f32.mrf.mxu0  ;;  %v210_v16 = vpop.f32.mrf.mxu1 }
 0x147   :  { %v201_v17 = vadd.f32 %v226_v7, %v200_v8  ;;  %v211_v18 = vadd.f32 %v226_v7, %v210_v16 }
 0x148   :  { %v202_v19 = vpop.f32.mrf.mxu0  ;;  %v212_v20 = vpop.f32.mrf.mxu1 }
 0x149   :  { %v215_v21 = vmax.f32 %v201_v17, 0.0  ;;  %v217_v22 = vmax.f32 %v211_v18, 0.0 }
 0x14b   :  { %219 = vst [vmem:[%s526_s3 + $0x8] sm:$0xff] %v215_v21  ;;  %221 = vst [vmem:[%s526_s3 + $0x18] sm:$0xff] %v217_v22 }

</bundles_post_ra>
